<compile_context>
chip_gen: v5e
topology: v5e:2x2
jax: 0.10.0
libtpu: 0.0.40
codegen_flags: <defaults>
</compile_context>

<pallas_src>
import functools
import math

import jax
import jax.numpy as jnp
import numpy as np
from jax import lax
from jax.experimental import pallas as pl
from jax.experimental.pallas import tpu as pltpu


def _round_up(v, m):
    return ((v + m - 1) // m) * m


def _pad_blocks(w, n_blocks, d_in, dp_in, d_out, dp_out):
    """Pad a block-stacked weight (n_blocks*d_in, d_out) -> (n_blocks*dp_in, dp_out).

    Each (d_in, d_out) block is zero-padded independently so the in-kernel
    concatenation order [block0-feat, block1-feat, ...] (each width dp_in)
    lines up with the padded weight rows.
    """
    blocks = [w[i * d_in:(i + 1) * d_in] for i in range(n_blocks)]
    blocks = [jnp.pad(b, ((0, dp_in - d_in), (0, dp_out - d_out))) for b in blocks]
    return jnp.concatenate(blocks, axis=0)


def ggnn_kernel(x_ref, adj_ref, wf_ref, bf_ref, wg_ref, wo_ref, bo_ref, o_ref,
                *, graph_hops, bt, n, compute_dtype):
    dp = x_ref.shape[-1]
    rows = bt * n
    inv_sqrt2 = jnp.float32(1.0 / math.sqrt(2.0))

    # Weights resident in VMEM (already in compute_dtype from the wrapper).
    wf = wf_ref[...]          # (4*dp, dp)
    wg = wg_ref[...]          # (2*dp, dp)
    wo = wo_ref[...]          # (dp, dp_out)
    bo = bo_ref[...]          # (1, dp_out) f32
    # Hoisted bias broadcast (JAX does not CSE broadcast_in_dim inside the loop).
    bf = jnp.broadcast_to(bf_ref[...], (rows, dp))   # (rows, dp) f32

    # Build stacked adjacency [adj ; adj^T] once per grid step from the int8
    # input (in-kernel XLU transpose; no adj^T HBM stream). Degree sums are
    # taken from the f32 copy that the transpose needs anyway.
    a32 = adj_ref[...].astype(jnp.float32)                               # (bt, n, n)
    adj_stk32 = jnp.concatenate([a32, jnp.swapaxes(a32, 1, 2)], axis=1)  # (bt, 2n, n)
    inv_norm = 1.0 / (jnp.sum(adj_stk32, axis=-1, keepdims=True) + 1.0)  # (bt, 2n, 1)
    inv_nb = inv_norm[:, :n, :]   # backward direction: rows of adj
    inv_nf = inv_norm[:, n:, :]   # forward  direction: rows of adj^T
    adj_stk = adj_stk32.astype(compute_dtype)                            # (bt, 2n, n)

    def hop(_, x2d):
        # x2d: (rows, dp) float32 carry (batch-packed node features).
        x3f = x2d.reshape(bt, n, dp)
        x3c = x3f.astype(compute_dtype)

        # Fused bidirectional message passing: one (2n, n) @ (n, dp) per batch.
        msgs = jnp.einsum('bij,bjd->bid', adj_stk, x3c,
                          preferred_element_type=jnp.float32)            # (bt, 2n, dp)
        bw = ((msgs[:, :n, :] + x3f) * inv_nb).reshape(rows, dp)
        fw = ((msgs[:, n:, :] + x3f) * inv_nf).reshape(rows, dp)

        # GatedFusion(h_state=fw, input=bw): single wide-K (4*dp) matmul.
        cat_f = jnp.concatenate([fw, bw, fw * bw, fw - bw],
                                axis=-1).astype(compute_dtype)           # (rows, 4*dp)
        zf = jax.nn.sigmoid(
            jnp.dot(cat_f, wf, preferred_element_type=jnp.float32) + bf)
        agg = (1.0 - zf) * fw + zf * bw

        # GRUStep(h_state=x_in, input=agg): single wide-K (2*dp) matmul, no bias.
        cat_g = jnp.concatenate([x2d, agg], axis=-1).astype(compute_dtype)  # (rows, 2*dp)
        zg = jax.nn.sigmoid(jnp.dot(cat_g, wg, preferred_element_type=jnp.float32))
        x_new = (1.0 - zg) * x2d + zg * agg

        # Residual scaling.
        return (x_new + x2d) * inv_sqrt2

    x0 = x_ref[...].astype(jnp.float32).reshape(rows, dp)
    x_fin = lax.fori_loop(0, graph_hops, hop, x0, unroll=graph_hops <= 4)

    # Output projection + relu (lane-dense padded output width).
    out = jnp.dot(x_fin.astype(compute_dtype), wo,
                  preferred_element_type=jnp.float32) + bo
    o_ref[...] = jnp.maximum(out, 0.0).astype(o_ref.dtype).reshape(o_ref.shape)


def _block_bytes(bt, np_, dp, dp_out, mm_size, x_size, out_size):
    """Rough per-grid-step VMEM estimate (double-buffered blocks + weights + temps)."""
    rows = bt * np_
    blocks = (2 * bt * np_ * np_ * 1            # adj int8 block
              + 2 * rows * dp * x_size          # x block
              + 2 * rows * dp_out * out_size)   # out block
    weights = 2 * ((4 * dp * dp + 2 * dp * dp + dp * dp_out) * mm_size
                   + (dp + dp_out) * 4)
    temps = bt * 2 * np_ * np_ * (4 + mm_size) + 12 * rows * dp * 4
    return blocks + weights + temps


def ggnn_forward(x, adj, params, graph_hops, *, use_bf16=True, batch_tile=None):
    B, N, D = x.shape
    d_out = params["wo"].shape[1]
    dp = _round_up(D, 128)
    dp_out = _round_up(d_out, 128)
    Np = _round_up(N, 8)                       # keep sublane slices aligned
    mm_dtype = jnp.bfloat16 if use_bf16 else jnp.float32
    io_dtype = jnp.bfloat16 if use_bf16 else jnp.float32
    mm_size = jnp.dtype(mm_dtype).itemsize
    io_size = jnp.dtype(io_dtype).itemsize

    # Generation-aware VMEM budget (64 MiB on v7x, 128 MiB on v5e/v6e).
    try:
        vmem_cap = int(pltpu.get_tpu_info().vmem_capacity_bytes)
    except Exception:
        vmem_cap = 64 << 20
    vmem_budget = int(vmem_cap * 0.85)

    # Batch packing: largest divisor of B that (a) keeps >= 2 grid steps so
    # v7x's second TensorCore gets work, (b) targets up to ~1024 packed rows
    # for MXU fill, and (c) fits the per-generation VMEM budget.
    if batch_tile is None:
        bt_cap = max(1, B // 2)
        batch_tile = 1
        for cand in range(1, bt_cap + 1):
            if B % cand:
                continue
            if cand * Np > 1024:
                continue
            if _block_bytes(cand, Np, dp, dp_out, mm_size, io_size, io_size) > vmem_budget:
                continue
            batch_tile = cand
    bt = batch_tile
    assert B % bt == 0, "batch_tile must divide the batch size"

    # Lane/sublane padding (zeros; exact w.r.t. the unpadded math).
    x_p = jnp.pad(x, ((0, 0), (0, Np - N), (0, dp - D))).astype(io_dtype)
    adj_i8 = jnp.pad(adj, ((0, 0), (0, Np - N), (0, Np - N))).astype(jnp.int8)
    wf_p = _pad_blocks(params["wf"], 4, D, dp, D, dp).astype(mm_dtype)
    wg_p = _pad_blocks(params["wg"], 2, D, dp, D, dp).astype(mm_dtype)
    wo_p = _pad_blocks(params["wo"], 1, D, dp, d_out, dp_out).astype(mm_dtype)
    bf_p = jnp.pad(params["bf"], ((0, 0), (0, dp - D)))
    bo_p = jnp.pad(params["bo"], ((0, 0), (0, dp_out - d_out)))

    kernel = functools.partial(ggnn_kernel, graph_hops=graph_hops, bt=bt, n=Np,
                               compute_dtype=mm_dtype)

    est = _block_bytes(bt, Np, dp, dp_out, mm_size, io_size, io_size)
    vmem_limit = int(min(max(est + (4 << 20), 32 << 20), vmem_budget))

    out = pl.pallas_call(
        kernel,
        out_shape=jax.ShapeDtypeStruct((B, Np, dp_out), io_dtype),
        grid=(B // bt,),
        in_specs=[
            pl.BlockSpec((bt, Np, dp), lambda g: (g, 0, 0)),      # x (bf16 on fast path)
            pl.BlockSpec((bt, Np, Np), lambda g: (g, 0, 0)),      # adj (int8, single direction)
            pl.BlockSpec((4 * dp, dp), lambda g: (0, 0)),         # wf (fused GatedFusion weight)
            pl.BlockSpec((1, dp), lambda g: (0, 0)),              # bf
            pl.BlockSpec((2 * dp, dp), lambda g: (0, 0)),         # wg (fused GRU weight)
            pl.BlockSpec((dp, dp_out), lambda g: (0, 0)),         # wo
            pl.BlockSpec((1, dp_out), lambda g: (0, 0)),          # bo
        ],
        out_specs=pl.BlockSpec((bt, Np, dp_out), lambda g: (g, 0, 0)),
        compiler_params=pltpu.CompilerParams(
            dimension_semantics=("parallel",),
            vmem_limit_bytes=vmem_limit),
    )(x_p, adj_i8, wf_p, bf_p, wg_p, wo_p, bo_p)

    return out[:, :N, :d_out].astype(jnp.float32)


def ggnn_ref(x, adj, params, graph_hops):
    """Pure-JAX f32 reference mirroring the PyTorch forward (eval mode)."""
    wf, bf = params["wf"], params["bf"]
    wg, wo, bo = params["wg"], params["wo"], params["bo"]
    for _ in range(graph_hops):
        x_in = x
        norm_bw = jnp.sum(adj, axis=2, keepdims=True) + 1.0
        bw = (jnp.einsum("bij,bjd->bid", adj, x_in) + x_in) / norm_bw
        adj_t = jnp.swapaxes(adj, 1, 2)
        norm_fw = jnp.sum(adj_t, axis=2, keepdims=True) + 1.0
        fw = (jnp.einsum("bij,bjd->bid", adj_t, x_in) + x_in) / norm_fw
        cat = jnp.concatenate([fw, bw, fw * bw, fw - bw], axis=-1)
        zf = jax.nn.sigmoid(cat @ wf + bf[0])
        agg = (1.0 - zf) * fw + zf * bw
        zg = jax.nn.sigmoid(jnp.concatenate([x_in, agg], axis=-1) @ wg)
        x_new = (1.0 - zg) * x_in + zg * agg
        x = (x_new + x_in) / math.sqrt(2.0)
    return jnp.maximum(x @ wo + bo[0], 0.0)


def init_params(key, d_in, d_out):
    ks = jax.random.split(key, 5)
    s_f = 1.0 / math.sqrt(4 * d_in)
    s_g = 1.0 / math.sqrt(2 * d_in)
    s_o = 1.0 / math.sqrt(d_in)
    return {
        # GatedFusion fc_z: Linear(4*d_in -> d_in, bias=True); stored transposed (in, out),
        # row blocks ordered [h, in, h*in, h-in].
        "wf": jax.random.normal(ks[0], (4 * d_in, d_in), jnp.float32) * s_f,
        "bf": jax.random.normal(ks[1], (1, d_in), jnp.float32) * s_f,
        # GRUStep linear_z: Linear(2*d_in -> d_in, bias=False); blocks [h_state, input].
        "wg": jax.random.normal(ks[2], (2 * d_in, d_in), jnp.float32) * s_g,
        # out_prj: Linear(d_in -> d_out, bias=True), transposed.
        "wo": jax.random.normal(ks[3], (d_in, d_out), jnp.float32) * s_o,
        "bo": jax.random.normal(ks[4], (1, d_out), jnp.float32) * s_o,
    }


if __name__ == "__main__":
    B, N, D, D_OUT = 2, 8, 32, 16
    GRAPH_HOPS = 2

    key = jax.random.PRNGKey(0)
    kx, kadj, kp = jax.random.split(key, 3)
    x = jax.random.normal(kx, (B, N, D), jnp.float32)
    adj = (jax.random.uniform(kadj, (B, N, N), jnp.float32) > 0.5).astype(jnp.float32)
    params = init_params(kp, D, D_OUT)

    ref = ggnn_ref(x, adj, params, GRAPH_HOPS)

    # Exact path: f32 matmul operands must match the reference tightly.
    out_f32 = jax.block_until_ready(
        ggnn_forward(x, adj, params, GRAPH_HOPS, use_bf16=False))
    np.testing.assert_allclose(np.asarray(out_f32), np.asarray(ref),
                               rtol=1e-4, atol=1e-4)

    # Fast path: bf16 MXU operands / bf16 x + output DMA, f32 accumulation and
    # f32 gate math inside the kernel.
    out_bf16 = jax.block_until_ready(
        ggnn_forward(x, adj, params, GRAPH_HOPS, use_bf16=True))
    np.testing.assert_allclose(np.asarray(out_bf16), np.asarray(ref),
                               rtol=5e-2, atol=5e-2)

    print("KERNEL_OK")
</pallas_src>

<mosaic_0001>
module attributes {stable_mosaic.version = 11 : i64} {
  func.func @ggnn_kernel(%arg0: i32, %arg1: memref<1x8x128xf32, #tpu.memory_space<vmem>>, %arg2: memref<1x8x8xi8, #tpu.memory_space<vmem>>, %arg3: memref<512x128xf32, #tpu.memory_space<vmem>>, %arg4: memref<1x128xf32, #tpu.memory_space<vmem>>, %arg5: memref<256x128xf32, #tpu.memory_space<vmem>>, %arg6: memref<128x128xf32, #tpu.memory_space<vmem>>, %arg7: memref<1x128xf32, #tpu.memory_space<vmem>>, %arg8: memref<1x8x128xf32, #tpu.memory_space<vmem>>) attributes {dimension_semantics = [#tpu.dimension_semantics<parallel>], iteration_bounds = array<i64: 2>, scalar_prefetch = 0 : i64, scratch_operands = 0 : i64, tpu.core_type = #tpu.core_type<tc>, window_params = [{transform_indices = @transform_0, window_bounds = array<i64: 1, 8, 128>}, {transform_indices = @transform_1, window_bounds = array<i64: 1, 8, 8>}, {pipeline_mode = #tpu.pipeline_mode<synchronous>, transform_indices = @transform_2, window_bounds = array<i64: 512, 128>}, {pipeline_mode = #tpu.pipeline_mode<synchronous>, transform_indices = @transform_3, window_bounds = array<i64: 1, 128>}, {pipeline_mode = #tpu.pipeline_mode<synchronous>, transform_indices = @transform_4, window_bounds = array<i64: 256, 128>}, {pipeline_mode = #tpu.pipeline_mode<synchronous>, transform_indices = @transform_5, window_bounds = array<i64: 128, 128>}, {pipeline_mode = #tpu.pipeline_mode<synchronous>, transform_indices = @transform_6, window_bounds = array<i64: 1, 128>}, {transform_indices = @transform_7, window_bounds = array<i64: 1, 8, 128>}]} {
    %c0 = arith.constant 0 : index
    %c0_0 = arith.constant 0 : index
    %0 = vector.load %arg3[%c0, %c0_0] : memref<512x128xf32, #tpu.memory_space<vmem>>, vector<512x128xf32>
    %c0_1 = arith.constant 0 : index
    %c0_2 = arith.constant 0 : index
    %1 = vector.load %arg5[%c0_1, %c0_2] : memref<256x128xf32, #tpu.memory_space<vmem>>, vector<256x128xf32>
    %c0_3 = arith.constant 0 : index
    %c0_4 = arith.constant 0 : index
    %2 = vector.load %arg6[%c0_3, %c0_4] : memref<128x128xf32, #tpu.memory_space<vmem>>, vector<128x128xf32>
    %c0_5 = arith.constant 0 : index
    %c0_6 = arith.constant 0 : index
    %3 = vector.load %arg7[%c0_5, %c0_6] : memref<1x128xf32, #tpu.memory_space<vmem>>, vector<1x128xf32>
    %c0_7 = arith.constant 0 : index
    %c0_8 = arith.constant 0 : index
    %4 = vector.load %arg4[%c0_7, %c0_8] : memref<1x128xf32, #tpu.memory_space<vmem>>, vector<1x128xf32>
    %5 = vector.shape_cast %4 : vector<1x128xf32> to vector<1x128xf32>
    %6 = vector.broadcast %5 : vector<1x128xf32> to vector<8x128xf32>
    %c0_9 = arith.constant 0 : index
    %c0_10 = arith.constant 0 : index
    %c0_11 = arith.constant 0 : index
    %7 = vector.load %arg2[%c0_9, %c0_10, %c0_11] : memref<1x8x8xi8, #tpu.memory_space<vmem>>, vector<1x8x8xi8>
    %8 = arith.sitofp %7 : vector<1x8x8xi8> to vector<1x8x8xf32>
    %9 = tpu.transpose %8, [0, 2, 1] : vector<1x8x8xf32> -> vector<1x8x8xf32>
    %10 = tpu.concatenate %8, %9 in 1 : vector<1x8x8xf32>, vector<1x8x8xf32> -> vector<1x16x8xf32>
    %cst = arith.constant dense<0.000000e+00> : vector<1x16xf32>
    %11 = vector.multi_reduction <add>, %10, %cst [2] : vector<1x16x8xf32> to vector<1x16xf32>
    %12 = vector.shape_cast %11 : vector<1x16xf32> to vector<1x16x1xf32>
    %cst_12 = arith.constant 1.000000e+00 : f32
    %13 = vector.broadcast %cst_12 : f32 to vector<1x16x1xf32>
    %14 = arith.addf %12, %13 : vector<1x16x1xf32>
    %cst_13 = arith.constant 1.000000e+00 : f32
    %15 = vector.broadcast %cst_13 : f32 to vector<1x16x1xf32>
    %16 = arith.divf %15, %14 : vector<1x16x1xf32>
    %17 = vector.extract_strided_slice %16 {offsets = [0, 0, 0], sizes = [1, 8, 1], strides = [1, 1, 1]} : vector<1x16x1xf32> to vector<1x8x1xf32>
    %18 = vector.extract_strided_slice %16 {offsets = [0, 8, 0], sizes = [1, 8, 1], strides = [1, 1, 1]} : vector<1x16x1xf32> to vector<1x8x1xf32>
    %c0_14 = arith.constant 0 : index
    %c0_15 = arith.constant 0 : index
    %c0_16 = arith.constant 0 : index
    %19 = vector.load %arg1[%c0_14, %c0_15, %c0_16] : memref<1x8x128xf32, #tpu.memory_space<vmem>>, vector<1x8x128xf32>
    %20 = vector.shape_cast %19 : vector<1x8x128xf32> to vector<8x128xf32>
    %cst_17 = arith.constant 0.707106769 : f32
    %c0_i32 = arith.constant 0 : i32
    %21 = vector.shape_cast %20 : vector<8x128xf32> to vector<1x8x128xf32>
    "tpu.trace_start"() <{level = 10 : i32, message = "bij,bjd->bid"}> : () -> ()
    %cst_18 = arith.constant dense<0.000000e+00> : vector<1x16x128xf32>
    %22 = tpu.matmul %10, %21, %cst_18 {dimension_numbers = #tpu.dot_dimension_numbers<[2], [1], [1], [2], [0, 0, 0, 1, 1, 2], [0], [0]>} : vector<1x16x8xf32>, vector<1x8x128xf32>, vector<1x16x128xf32> -> vector<1x16x128xf32>
    "tpu.trace_stop"() : () -> ()
    %23 = vector.extract_strided_slice %22 {offsets = [0, 0, 0], sizes = [1, 8, 128], strides = [1, 1, 1]} : vector<1x16x128xf32> to vector<1x8x128xf32>
    %24 = arith.addf %23, %21 : vector<1x8x128xf32>
    %25 = vector.broadcast %17 : vector<1x8x1xf32> to vector<1x8x128xf32>
    %26 = arith.mulf %24, %25 : vector<1x8x128xf32>
    %27 = vector.shape_cast %26 : vector<1x8x128xf32> to vector<8x128xf32>
    %28 = vector.extract_strided_slice %22 {offsets = [0, 8, 0], sizes = [1, 8, 128], strides = [1, 1, 1]} : vector<1x16x128xf32> to vector<1x8x128xf32>
    %29 = arith.addf %28, %21 : vector<1x8x128xf32>
    %30 = vector.broadcast %18 : vector<1x8x1xf32> to vector<1x8x128xf32>
    %31 = arith.mulf %29, %30 : vector<1x8x128xf32>
    %32 = vector.shape_cast %31 : vector<1x8x128xf32> to vector<8x128xf32>
    %33 = arith.mulf %32, %27 : vector<8x128xf32>
    %34 = arith.subf %32, %27 : vector<8x128xf32>
    %35 = tpu.concatenate %32, %27, %33, %34 in 1 : vector<8x128xf32>, vector<8x128xf32>, vector<8x128xf32>, vector<8x128xf32> -> vector<8x512xf32>
    %cst_19 = arith.constant dense<0.000000e+00> : vector<8x128xf32>
    %36 = tpu.matmul %35, %0, %cst_19 {dimension_numbers = #tpu.dot_dimension_numbers<[1], [0], [0], [1], [0, 0, 1, 1], [], []>} : vector<8x512xf32>, vector<512x128xf32>, vector<8x128xf32> -> vector<8x128xf32>
    %37 = arith.addf %36, %6 : vector<8x128xf32>
    %38 = arith.negf %37 : vector<8x128xf32>
    %39 = math.exp %38 : vector<8x128xf32>
    %cst_20 = arith.constant 1.000000e+00 : f32
    %40 = vector.broadcast %cst_20 : f32 to vector<8x128xf32>
    %41 = arith.addf %40, %39 : vector<8x128xf32>
    %42 = arith.divf %40, %41 : vector<8x128xf32>
    %cst_21 = arith.constant 1.000000e+00 : f32
    %43 = vector.broadcast %cst_21 : f32 to vector<8x128xf32>
    %44 = arith.subf %43, %42 : vector<8x128xf32>
    %45 = arith.mulf %44, %32 : vector<8x128xf32>
    %46 = arith.mulf %42, %27 : vector<8x128xf32>
    %47 = arith.addf %45, %46 : vector<8x128xf32>
    %48 = tpu.concatenate %20, %47 in 1 : vector<8x128xf32>, vector<8x128xf32> -> vector<8x256xf32>
    %cst_22 = arith.constant dense<0.000000e+00> : vector<8x128xf32>
    %49 = tpu.matmul %48, %1, %cst_22 {dimension_numbers = #tpu.dot_dimension_numbers<[1], [0], [0], [1], [0, 0, 1, 1], [], []>} : vector<8x256xf32>, vector<256x128xf32>, vector<8x128xf32> -> vector<8x128xf32>
    %50 = arith.negf %49 : vector<8x128xf32>
    %51 = math.exp %50 : vector<8x128xf32>
    %cst_23 = arith.constant 1.000000e+00 : f32
    %52 = vector.broadcast %cst_23 : f32 to vector<8x128xf32>
    %53 = arith.addf %52, %51 : vector<8x128xf32>
    %54 = arith.divf %52, %53 : vector<8x128xf32>
    %cst_24 = arith.constant 1.000000e+00 : f32
    %55 = vector.broadcast %cst_24 : f32 to vector<8x128xf32>
    %56 = arith.subf %55, %54 : vector<8x128xf32>
    %57 = arith.mulf %56, %20 : vector<8x128xf32>
    %58 = arith.mulf %54, %47 : vector<8x128xf32>
    %59 = arith.addf %57, %58 : vector<8x128xf32>
    %60 = arith.addf %59, %20 : vector<8x128xf32>
    %61 = vector.broadcast %cst_17 : f32 to vector<8x128xf32>
    %62 = arith.mulf %60, %61 : vector<8x128xf32>
    %c1_i32 = arith.constant 1 : i32
    %63 = vector.shape_cast %62 : vector<8x128xf32> to vector<1x8x128xf32>
    "tpu.trace_start"() <{level = 10 : i32, message = "bij,bjd->bid"}> : () -> ()
    %cst_25 = arith.constant dense<0.000000e+00> : vector<1x16x128xf32>
    %64 = tpu.matmul %10, %63, %cst_25 {dimension_numbers = #tpu.dot_dimension_numbers<[2], [1], [1], [2], [0, 0, 0, 1, 1, 2], [0], [0]>} : vector<1x16x8xf32>, vector<1x8x128xf32>, vector<1x16x128xf32> -> vector<1x16x128xf32>
    "tpu.trace_stop"() : () -> ()
    %65 = vector.extract_strided_slice %64 {offsets = [0, 0, 0], sizes = [1, 8, 128], strides = [1, 1, 1]} : vector<1x16x128xf32> to vector<1x8x128xf32>
    %66 = arith.addf %65, %63 : vector<1x8x128xf32>
    %67 = vector.broadcast %17 : vector<1x8x1xf32> to vector<1x8x128xf32>
    %68 = arith.mulf %66, %67 : vector<1x8x128xf32>
    %69 = vector.shape_cast %68 : vector<1x8x128xf32> to vector<8x128xf32>
    %70 = vector.extract_strided_slice %64 {offsets = [0, 8, 0], sizes = [1, 8, 128], strides = [1, 1, 1]} : vector<1x16x128xf32> to vector<1x8x128xf32>
    %71 = arith.addf %70, %63 : vector<1x8x128xf32>
    %72 = vector.broadcast %18 : vector<1x8x1xf32> to vector<1x8x128xf32>
    %73 = arith.mulf %71, %72 : vector<1x8x128xf32>
    %74 = vector.shape_cast %73 : vector<1x8x128xf32> to vector<8x128xf32>
    %75 = arith.mulf %74, %69 : vector<8x128xf32>
    %76 = arith.subf %74, %69 : vector<8x128xf32>
    %77 = tpu.concatenate %74, %69, %75, %76 in 1 : vector<8x128xf32>, vector<8x128xf32>, vector<8x128xf32>, vector<8x128xf32> -> vector<8x512xf32>
    %cst_26 = arith.constant dense<0.000000e+00> : vector<8x128xf32>
    %78 = tpu.matmul %77, %0, %cst_26 {dimension_numbers = #tpu.dot_dimension_numbers<[1], [0], [0], [1], [0, 0, 1, 1], [], []>} : vector<8x512xf32>, vector<512x128xf32>, vector<8x128xf32> -> vector<8x128xf32>
    %79 = arith.addf %78, %6 : vector<8x128xf32>
    %80 = arith.negf %79 : vector<8x128xf32>
    %81 = math.exp %80 : vector<8x128xf32>
    %cst_27 = arith.constant 1.000000e+00 : f32
    %82 = vector.broadcast %cst_27 : f32 to vector<8x128xf32>
    %83 = arith.addf %82, %81 : vector<8x128xf32>
    %84 = arith.divf %82, %83 : vector<8x128xf32>
    %cst_28 = arith.constant 1.000000e+00 : f32
    %85 = vector.broadcast %cst_28 : f32 to vector<8x128xf32>
    %86 = arith.subf %85, %84 : vector<8x128xf32>
    %87 = arith.mulf %86, %74 : vector<8x128xf32>
    %88 = arith.mulf %84, %69 : vector<8x128xf32>
    %89 = arith.addf %87, %88 : vector<8x128xf32>
    %90 = tpu.concatenate %62, %89 in 1 : vector<8x128xf32>, vector<8x128xf32> -> vector<8x256xf32>
    %cst_29 = arith.constant dense<0.000000e+00> : vector<8x128xf32>
    %91 = tpu.matmul %90, %1, %cst_29 {dimension_numbers = #tpu.dot_dimension_numbers<[1], [0], [0], [1], [0, 0, 1, 1], [], []>} : vector<8x256xf32>, vector<256x128xf32>, vector<8x128xf32> -> vector<8x128xf32>
    %92 = arith.negf %91 : vector<8x128xf32>
    %93 = math.exp %92 : vector<8x128xf32>
    %cst_30 = arith.constant 1.000000e+00 : f32
    %94 = vector.broadcast %cst_30 : f32 to vector<8x128xf32>
    %95 = arith.addf %94, %93 : vector<8x128xf32>
    %96 = arith.divf %94, %95 : vector<8x128xf32>
    %cst_31 = arith.constant 1.000000e+00 : f32
    %97 = vector.broadcast %cst_31 : f32 to vector<8x128xf32>
    %98 = arith.subf %97, %96 : vector<8x128xf32>
    %99 = arith.mulf %98, %62 : vector<8x128xf32>
    %100 = arith.mulf %96, %89 : vector<8x128xf32>
    %101 = arith.addf %99, %100 : vector<8x128xf32>
    %102 = arith.addf %101, %62 : vector<8x128xf32>
    %103 = vector.broadcast %cst_17 : f32 to vector<8x128xf32>
    %104 = arith.mulf %102, %103 : vector<8x128xf32>
    %cst_32 = arith.constant dense<0.000000e+00> : vector<8x128xf32>
    %105 = tpu.matmul %104, %2, %cst_32 {dimension_numbers = #tpu.dot_dimension_numbers<[1], [0], [0], [1], [0, 0, 1, 1], [], []>} : vector<8x128xf32>, vector<128x128xf32>, vector<8x128xf32> -> vector<8x128xf32>
    %106 = vector.broadcast %3 : vector<1x128xf32> to vector<8x128xf32>
    %107 = arith.addf %105, %106 : vector<8x128xf32>
    %cst_33 = arith.constant 0.000000e+00 : f32
    %108 = vector.broadcast %cst_33 : f32 to vector<8x128xf32>
    %109 = arith.maximumf %107, %108 : vector<8x128xf32>
    %110 = vector.shape_cast %109 : vector<8x128xf32> to vector<1x8x128xf32>
    %c0_34 = arith.constant 0 : index
    %c0_35 = arith.constant 0 : index
    %c0_36 = arith.constant 0 : index
    %111 = vector.load %arg8[%c0_34, %c0_35, %c0_36] : memref<1x8x128xf32, #tpu.memory_space<vmem>>, vector<1x8x128xf32>
    tpu.vector_store %arg8[%c0_34, %c0_35, %c0_36], %110 {strides = array<i32>} : memref<1x8x128xf32, #tpu.memory_space<vmem>>, vector<1x8x128xf32>,
    return
  }
  func.func @transform_0(%arg0: i32) -> (i32, i32, i32) {
    %c0_i32 = arith.constant 0 : i32
    %c0_i32_0 = arith.constant 0 : i32
    %c0_i32_1 = arith.constant 0 : i32
    return %arg0, %c0_i32, %c0_i32_0 : i32, i32, i32
  }
  func.func @transform_1(%arg0: i32) -> (i32, i32, i32) {
    %c0_i32 = arith.constant 0 : i32
    %c0_i32_0 = arith.constant 0 : i32
    %c0_i32_1 = arith.constant 0 : i32
    return %arg0, %c0_i32, %c0_i32_0 : i32, i32, i32
  }
  func.func @transform_2(%arg0: i32) -> (i32, i32) {
    %c0_i32 = arith.constant 0 : i32
    %c0_i32_0 = arith.constant 0 : i32
    %c0_i32_1 = arith.constant 0 : i32
    return %c0_i32, %c0_i32_0 : i32, i32
  }
  func.func @transform_3(%arg0: i32) -> (i32, i32) {
    %c0_i32 = arith.constant 0 : i32
    %c0_i32_0 = arith.constant 0 : i32
    %c0_i32_1 = arith.constant 0 : i32
    return %c0_i32, %c0_i32_0 : i32, i32
  }
  func.func @transform_4(%arg0: i32) -> (i32, i32) {
    %c0_i32 = arith.constant 0 : i32
    %c0_i32_0 = arith.constant 0 : i32
    %c0_i32_1 = arith.constant 0 : i32
    return %c0_i32, %c0_i32_0 : i32, i32
  }
  func.func @transform_5(%arg0: i32) -> (i32, i32) {
    %c0_i32 = arith.constant 0 : i32
    %c0_i32_0 = arith.constant 0 : i32
    %c0_i32_1 = arith.constant 0 : i32
    return %c0_i32, %c0_i32_0 : i32, i32
  }
  func.func @transform_6(%arg0: i32) -> (i32, i32) {
    %c0_i32 = arith.constant 0 : i32
    %c0_i32_0 = arith.constant 0 : i32
    %c0_i32_1 = arith.constant 0 : i32
    return %c0_i32, %c0_i32_0 : i32, i32
  }
  func.func @transform_7(%arg0: i32) -> (i32, i32, i32) {
    %c0_i32 = arith.constant 0 : i32
    %c0_i32_0 = arith.constant 0 : i32
    %c0_i32_1 = arith.constant 0 : i32
    return %arg0, %c0_i32, %c0_i32_0 : i32, i32, i32
  }
}

</mosaic_0001>

<bundles_post_ra>
// kernel: tpu_custom_call.1
= control target key start
LH: loop header
LB: loop body
LE: loop exit
PB: predicated region body
PF: predicated region fallthrough
CT: control target
= control target key end

     0   :  { %s2100_s0 = inlined_call_operand.hbm [shape: f32[2,8,128], index: 0, kind: input, shape index: {}]   ;;  %s2101_s1 = inlined_call_operand.hbm [shape: s8[2,8,8], index: 1, kind: input, shape index: {}]   ;;  %s2102_s2 = inlined_call_operand.hbm [shape: f32[512,128], index: 2, kind: input, shape index: {}]   ;;  %s2103_s3 = inlined_call_operand.vmem [shape: f32[1,128], index: 3, kind: input, shape index: {}]   ;;  %s2104_s4 = inlined_call_operand.hbm [shape: f32[256,128], index: 4, kind: input, shape index: {}]   ;;  %s2105_s5 = inlined_call_operand.hbm [shape: f32[128,128], index: 5, kind: input, shape index: {}]   ;;  %s2106_s6 = inlined_call_operand.vmem [shape: f32[1,128], index: 6, kind: input, shape index: {}]   ;;  %s2107_s7 = inlined_call_operand.hbm [shape: f32[2,8,128], index: 7, kind: output, shape index: {}]  }
   0x1   :  { %2130 = sst [smem:[#allocation39_spill]] %s2102_s2 }
   0x2   :  { %2131 = sst [smem:[#allocation40_spill]] %s2104_s4 }
   0x3   :  { %2132 = sst [smem:[#allocation41_spill]] %s2105_s5 }
   0x4   :  { %12 = vsyncpa [#allocation3], 0 }
   0x5   :  { %14 = vsyncpa [#allocation3 + $0x1], 0 }
   0x6   :  { %15 = vsyncpa [#allocation6], 0 }
   0x7   :  { %17 = vsyncpa [#allocation6 + $0x1], 0 }
   0x8   :  { %18 = vsyncpa [#allocation9], 0 }
   0x9   :  { %19 = vsyncpa [#allocation4], 0 }
   0xa   :  { %21 = vsyncpa [#allocation4 + $0x1], 0  ;;  %s1549_s24 = smov 0   ;;  %s1551_s25 = smov 0  }
   0xb   :  { %s1553_s26 = smov 0   ;;  %s1555_s27 = smov 0  }
   0xc LB: > { %2133 = sst [smem:[#allocation17_spill]] %s1498_s26  ;;  %s1573_s8 = sadd.s32 4294967295, %s1502_s27   ;;  %s1502_s27 = sphi %s1555_s27, %s2185_s27   ;;  %s1498_s26 = sphi %s1553_s26, %s2187_s26   ;;  %s1494_s25 = sphi %s1551_s25, %s2189_s25   ;;  %s1490_s24 = sphi %s1549_s24, %s2188_s24  }
   0xd   : > { %s2134_s2 = sld [smem:[#allocation39_spill]]  ;;  %p1139_p0 = scmp.ge.s32.totalorder %s1502_s27, 1 }
   0xe   : > { %p48_p1 = scmp.eq.s32.totalorder %s1573_s8, 0  ;;  %p215_p2 = scmp.lt.s32.totalorder %s1502_s27, 3 }
   0xf   : > { %s1504_s10 = smov [#allocation7]   ;;  %s2136_s4 = sld [smem:[#allocation40_spill]] }
  0x10   : > { %p1578_p3 = pnand %p1139_p0, %p215_p2  ;;  %s228_s11 = sshll.u32 %s1504_s10, 4  ;;  %s229_s11 = int_to_ptr.vmem [resolvable:$true] %s228_s11 }
  0x11   : > { %s2138_s5 = sld [smem:[#allocation41_spill]]  ;;  %s1505_s19 = smov [#allocation8]  }
  0x12   : > { %p1185_p4 = pneg %p1578_p3  ;;  %s245_s20 = sshll.u32 %s1505_s19, 4  ;;  %s246_s20 = int_to_ptr.vmem [resolvable:$true] %s245_s20 }
  0x13   : > { %s226_s30 = sshll.u32 %s2134_s2, 4  ;;  %s1506_s21 = smov 128   ;;  %s227_s30 = int_to_ptr.hbm [resolvable:$true] %s226_s30 }
  0x14   : > { %p1590_p6 = pnand %p1185_p4, %p48_p1  ;;  %s1507_s22 = smov 8  }
  0x15   : > { %s243_s14 = sshll.u32 %s2136_s4, 4  ;;  %s1508_s23 = smov [#allocation10]   ;;  %s244_s14 = int_to_ptr.hbm [resolvable:$true] %s243_s14 }
  0x16   : > { %1188 = dma.hbm_to_vmem [thread:$0]  (!%p1590_p6), %s227_s30, 8192, %s229_s11, [#allocation6], %s1506_s21, %s1506_s21, %s1507_s22  }
  0x17   : > { %s257_s18 = sshll.u32 %s2138_s5, 4  ;;  %s259_s28 = sshll.u32 %s1508_s23, 4  ;;  %s258_s18 = int_to_ptr.hbm [resolvable:$true] %s257_s18  ;;  %s260_s28 = int_to_ptr.vmem [resolvable:$true] %s259_s28 }
  0x18   : > { %1191 = dma.hbm_to_vmem [thread:$0]  (!%p1590_p6), %s244_s14, 4096, %s246_s20, [#allocation9], %s1506_s21, %s1506_s21, %s1507_s22  }
  0x19   : > { %1194 = dma.hbm_to_vmem [thread:$0]  (!%p1590_p6), %s258_s18, 2048, %s260_s28, [#allocation9], %s1506_s21, %s1506_s21, %s1507_s22  }
  0x1a   : > { %s1138_s29 = sadd.s32 4294967294, %s1502_s27   ;;  %s1605_s10 = sadd.s32 1, %s1502_s27  }
  0x1b   : > { %2139 = sst [smem:[#allocation18_spill]] %s1605_s10  ;;  %s34_s12 = sadd.s32 1, %s1498_s26 }
  0x1c   : > { %s31_s30 = ssub.s32 %s1502_s27, %s1605_s10  ;;  %p41_p7 = scmp.ne.s32.totalorder %s1498_s26, %s1494_s25 }
  0x1d   : > { %p32_p8 = scmp.eq.s32.totalorder %s31_s30, 0  ;;  %p42_p9 = scmp.eq.s32.totalorder %s1502_s27, 0 }
  0x1e   : > { %p47_p10 = scmp.ne.s32.totalorder %s1494_s25, %s1490_s24  ;;  %p202_p11 = scmp.eq.s32.totalorder %s1573_s8, 1 }
  0x1f   : > { %s1617_s11 = scalar_select %p32_p8, %s1498_s26, %s34_s12  }
  0x20   : > { %p1619_p12 = por %p42_p9, %p41_p7  ;;  %p1625_p13 = por %p48_p1, %p47_p10 }
  0x21   : > { %2140 = sst [smem:[#allocation19_spill]] %s1617_s11  ;;  %p1629_p0 = por %p202_p11, %p41_p7 }
  0x22   : > { %p208_p2 = scmp.eq.s32.totalorder %s1138_s29, 1  ;;  %p1209_p4 = scmp.lt.s32.totalorder %s1502_s27, 2 }
  0x23   : > { %s1635_s16 = sand.u32 1, %s1498_s26   ;;  %s1145_s19 = sshll.u32 %s1502_s27, 3 }
  0x24   : > { %p1637_p6 = por %p208_p2, %p47_p10  ;;  %s1144_s18 = sshll.u32 %s1635_s16, 3 }
  0x25   : > { %s284_s22 = scalar_lea.hbm %s2100_s0, %s1145_s19  ;;  %s280_s28 = scalar_lea.vmem [#allocation2], %s1144_s18 }
  0x26   : > { %s286_s23 = sshll.u32 %s284_s22, 4  ;;  %s288_s12 = sshll.u32 %s280_s28, 4  ;;  %s287_s23 = int_to_ptr.hbm [resolvable:$true] %s286_s23  ;;  %s289_s12 = int_to_ptr.vmem [resolvable:$true] %s288_s12 }
  0x27   : > { %p1648_p7 = pnand %p1209_p4, %p1619_p12  ;;  %s295_s30 = sand.u32 1, %s1502_s27  }
  0x28   : > { %s1146_s2 = sshll.u32 %s1635_s16, 1  ;;  %s277_s4 = scalar_lea.sflag [#allocation3], %s1635_s16 }
  0x29   : > { %s1364_s5 = sshra.s32 %s287_s23, 4  ;;  %p1368_p9 = pneg %p1648_p7  ;;  %s1365_s5 = int_to_ptr.hbm [resolvable:$true] %s1364_s5 }
  0x2a   : > { %s1366_s11 = scalar_lea.hbm %s1365_s5, 8  ;;  %s1371_s19 = scalar_lea.hbm %s2100_s0, 16 }
  0x2b   : > { %p1367_p8 = scmp.ne.s32.totalorder %s1365_s5, %s1366_s11  ;;  %p1372_p12 = scmp.lt.s32.totalorder %s1365_s5, %s2100_s0 }
  0x2c   : > { %p1373_p2 = scmp.lt.s32.totalorder %s1371_s19, %s1366_s11 }
  0x2d   : > { %p1369_p10 = pnand %p1368_p9, %p1367_p8 }
  0x2e   : > { %p1374_p4 = por %p1373_p2, %p1372_p12 }
  0x2f   : > { %p1370_p11 = pneg %p1369_p10 }
  0x31   : > { %p1375_p5 = pnand %p1374_p4, %p1370_p11 }
  0x33   : > { %1378 = shalt.err (!%p1375_p5)
}
  0x34   : > { %1198 = dma.hbm_to_vmem [thread:$0]  (!%p1648_p7), %s287_s23, 128, %s289_s12, %s277_s4  }
  0x35   : > { %s1147_s16 = sshll.u32 %s1502_s27, 1  ;;  %s299_s22 = scalar_lea.vmem [#allocation5], %s1146_s2 }
  0x36   : > { %s307_s28 = sshll.u32 %s299_s22, 4  ;;  %s303_s13 = scalar_lea.hbm %s2101_s1, %s1147_s16  ;;  %s308_s28 = int_to_ptr.vmem [resolvable:$true] %s307_s28 }
  0x37   : > { %s305_s18 = sshll.u32 %s303_s13, 4  ;;  %s296_s5 = scalar_lea.sflag [#allocation6], %s295_s30  ;;  %s306_s18 = int_to_ptr.hbm [resolvable:$true] %s305_s18 }
  0x38   : > { %s1394_s11 = sshra.s32 %s306_s18, 4  ;;  %s1401_s2 = scalar_lea.hbm %s2101_s1, 4  ;;  %s1395_s11 = int_to_ptr.hbm [resolvable:$true] %s1394_s11 }
  0x39   : > { %s1396_s19 = scalar_lea.hbm %s1395_s11, 2  ;;  %p1402_p11 = scmp.lt.s32.totalorder %s1395_s11, %s2101_s1 }
  0x3a   : > { %p1397_p5 = scmp.ne.s32.totalorder %s1395_s11, %s1396_s19  ;;  %p1403_p12 = scmp.lt.s32.totalorder %s1401_s2, %s1396_s19 }
  0x3c   : > { %p1399_p8 = pnand %p1397_p5, %p1368_p9  ;;  %p1404_p2 = por %p1403_p12, %p1402_p11 }
  0x3e   : > { %p1400_p10 = pneg %p1399_p8 }
  0x40   : > { %p1405_p4 = pnand %p1404_p2, %p1400_p10 }
  0x42   : > { %1408 = shalt.err (!%p1405_p4)
}
  0x43   : > { %1201 = dma.hbm_to_vmem [thread:$0]  (!%p1648_p7), %s306_s18, 32, %s308_s28, %s296_s5  }
  0x44   : > { %316 = sbr.rel (%p1578_p3) target bundleno = 1356 (0x54c), region = 48 }
  0x49   : > { %s1686_s26 = sand.u32 1, %s1494_s25  }
  0x4a   : > { %s1149_s10 = sshll.u32 %s1686_s26, 3  ;;  %s319_s30 = scalar_lea.sflag [#allocation3], %s1686_s26 }
  0x4b   : > { %s322_s21 = scalar_lea.vmem [#allocation2], %s1149_s10 }
  0x4c   : > { %1469 = dma.done.wait (%p1625_p13), %s319_s30, 128  }
  0x4d   : > { %1471 = vsyncadd (%p1625_p13), %s319_s30, 4294967168  ;;  %s328_s9 = sand.u32 1, %s1573_s8   ;;  %s1150_s29 = sshll.u32 %s1686_s26, 1 }
  0x4e   : > { %s329_s16 = scalar_lea.sflag [#allocation6], %s328_s9  ;;  %s332_s22 = scalar_lea.vmem [#allocation5], %s1150_s29 }
  0x4f   : > { %1473 = dma.done.wait (%p1625_p13), %s329_s16, 32  }
  0x50   : > { %1475 = vsyncadd (%p1625_p13), %s329_s16, 4294967264 }
  0x51   : > { %1477 = dma.done.wait (%p48_p1), [#allocation6], 8192  }
  0x52   : > { %1479 = vsyncadd (%p48_p1), [#allocation6], 4294959104 }
  0x53   : > { %1481 = dma.done.wait (%p48_p1), [#allocation9], 6144  }
  0x54   : > { %1483 = vsyncadd (%p48_p1), [#allocation9], 4294961152  ;;  %v501_v0 = vld [vmem:[%s332_s22] sm:$0x3]  ;;  %v1713_v3 = vld [vmem:[%s322_s21] sm:$0xff]  ;;  %vm536_vm0 = vcmask 64512  }
  0x55   : > { %v502_v1 = vunpack.c.0.s8 %v501_v0  ;;  %597 = vmatpush.msra.mxu0 %v1713_v3  ;;  %v1720_v5 = vld [vmem:[#allocation7 + $0xf8] sm:$0xff]  ;;  %v1722_v6 = vld [vmem:[#allocation7 + $0xf0] sm:$0xff]  ;;  %v1725_v7 = vld [vmem:[#allocation7 + $0xe8] sm:$0xff]  ;;  %s1164_s13 = sshll.u32 %s1573_s8, 3  ;;  %s383_s23 = scalar_lea.vmem [#allocation11], %s1149_s10 }
  0x56   : > { %631 = vmatpush.msra.mxu2 %v1720_v5  ;;  %v1728_v8 = vld [vmem:[#allocation7 + $0xe0] sm:$0xff]  ;;  %v1731_v9 = vld [vmem:[#allocation7 + $0xd8] sm:$0xff]  ;;  %v1741_v12 = vld [vmem:[#allocation7 + $0xd0] sm:$0xff]  ;;  %s1012_s4 = scalar_lea.hbm %s2107_s7, %s1164_s13  ;;  %s1014_s2 = sshll.u32 %s383_s23, 4  ;;  %s1015_s2 = int_to_ptr.vmem [resolvable:$true] %s1014_s2 }
  0x57   : > { %v1710_v2 = vcvt.s32.f32 %v502_v1  ;;  %v1743_v13 = vld [vmem:[#allocation7 + $0xc8] sm:$0xff]  ;;  %v1745_v14 = vld [vmem:[#allocation7 + $0x78] sm:$0xff]  ;;  %v1749_v15 = vld [vmem:[#allocation7 + $0x70] sm:$0xff]  ;;  %s1016_s12 = sshll.u32 %s1012_s4, 4  ;;  %s1002_s8 = scalar_lea.sflag [#allocation4], %s1686_s26  ;;  %s1017_s12 = int_to_ptr.hbm [resolvable:$true] %s1016_s12 }
  0x58   : > { %632 = vmatpush.msra.mxu2 %v1722_v6  ;;  %611 = vmatpush.msra.mxu1 %v1745_v14  ;;  %v1751_v16 = vld [vmem:[#allocation7 + $0x178] sm:$0xff]  ;;  %v1753_v17 = vld [vmem:[#allocation7 + $0xc0] sm:$0xff]  ;;  %v1758_v19 = vld [vmem:[#allocation7 + $0x68] sm:$0xff]  ;;  %s1438_s20 = sshra.s32 %s1017_s12, 4  ;;  %s1444_s29 = scalar_lea.hbm %s2107_s7, 16  ;;  %s1439_s20 = int_to_ptr.hbm [resolvable:$true] %s1438_s20 }
  0x59   : > { %504 = vxpose.xlu0.b32.start.end [1/1] (short) (narrow) %v1710_v2, 8  ;;  %1155 = vmatmul.msk.f32.vlgmr.msra.gmra.mxu0 %vm536_vm0, %v1710_v2  ;;  %v537_v4 = vsel %vm536_vm0, %v1710_v2, 0.0  ;;  %v1756_v18 = vld [vmem:[#allocation7 + $0x1f8] sm:$0xff]  ;;  %v1762_v20 = vld [vmem:[#allocation7 + $0x170] sm:$0xff]  ;;  %v1770_v23 = vld [vmem:[#allocation7 + $0x60] sm:$0xff]  ;;  %s1440_s30 = scalar_lea.hbm %s1439_s20, 8  ;;  %p1445_p7 = scmp.lt.s32.totalorder %s1439_s20, %s2107_s7 }
  0x5a   : > { %633 = vmatpush.msra.mxu2 %v1725_v7  ;;  %651 = vmatpush.msra.mxu3 %v1751_v16  ;;  %v1764_v21 = vld [vmem:[#allocation7 + $0x1f0] sm:$0xff]  ;;  %v1767_v22 = vld [vmem:[#allocation7 + $0xb8] sm:$0xff]  ;;  %v1772_v24 = vld [vmem:[#allocation7 + $0x168] sm:$0xff]  ;;  %p1441_p1 = scmp.ne.s32.totalorder %s1439_s20, %s1440_s30  ;;  %p1446_p9 = scmp.lt.s32.totalorder %s1444_s29, %s1440_s30 }
  0x5b   : > { %612 = vmatpush.msra.mxu1 %v1749_v15  ;;  %671 = vmatpush.msrb.mxu0 %v1756_v18  ;;  %2146 = vst [vmem:[#allocation20_spill] sm:$0xff] %v1767_v22  ;;  %v1776_v25 = vld [vmem:[#allocation7 + $0x1e8] sm:$0xff]  ;;  %v1778_v26 = vld [vmem:[#allocation7 + $0x160] sm:$0xff]  ;;  %v1781_v27 = vld [vmem:[#allocation7 + $0xb0] sm:$0xff] }
  0x5c   : > { %634 = vmatpush.msra.mxu2 %v1728_v8  ;;  %652 = vmatpush.msra.mxu3 %v1762_v20  ;;  %2147 = vst [vmem:[#allocation21_spill] sm:$0xff] %v1781_v27  ;;  %v1784_v28 = vld [vmem:[#allocation7 + $0x58] sm:$0xff]  ;;  %v1788_v29 = vld [vmem:[#allocation7 + $0x1e0] sm:$0xff]  ;;  %v1791_v30 = vld [vmem:[#allocation7 + $0xa8] sm:$0xff]  ;;  %p1442_p3 = pnand %p1441_p1, %p1629_p0  ;;  %p1447_p5 = por %p1446_p9, %p1445_p7 }
  0x5d   : > { %613 = vmatpush.msra.mxu1 %v1758_v19  ;;  %672 = vmatpush.msrb.mxu0 %v1764_v21  ;;  %2148 = vst [vmem:[#allocation22_spill] sm:$0xff] %v1791_v30  ;;  %v1798_v36 = vld [vmem:[#allocation7 + $0xa0] sm:$0xff]  ;;  %v1801_v37 = vld [vmem:[#allocation7 + $0x50] sm:$0xff]  ;;  %v1803_v38 = vld [vmem:[#allocation7 + $0x158] sm:$0xff] }
  0x5e   : > { %635 = vmatpush.msra.mxu2 %v1731_v9  ;;  %653 = vmatpush.msra.mxu3 %v1772_v24  ;;  %2149 = vst [vmem:[#allocation23_spill] sm:$0xff] %v1798_v36  ;;  %v1805_v39 = vld [vmem:[#allocation7 + $0x1d8] sm:$0xff]  ;;  %v1813_v43 = vld [vmem:[#allocation7 + $0x48] sm:$0xff]  ;;  %v1815_v44 = vld [vmem:[#allocation7 + $0x150] sm:$0xff]  ;;  %p1443_p13 = pneg %p1442_p3 }
  0x5f   : > { %614 = vmatpush.msra.mxu1 %v1770_v23  ;;  %673 = vmatpush.msrb.mxu0 %v1776_v25  ;;  %v1809_v41 = vld [vmem:[#allocation7 + $0x98] sm:$0xff]  ;;  %v1817_v45 = vld [vmem:[#allocation7 + $0x1d0] sm:$0xff]  ;;  %v1825_v51 = vld [vmem:[#allocation7 + $0x40] sm:$0xff] }
  0x60   : > { %636 = vmatpush.msra.mxu2 %v1741_v12  ;;  %654 = vmatpush.msra.mxu3 %v1778_v26  ;;  %2150 = vst [vmem:[#allocation24_spill] sm:$0xff] %v1809_v41  ;;  %v1821_v48 = vld [vmem:[#allocation7 + $0x90] sm:$0xff]  ;;  %v1827_v52 = vld [vmem:[#allocation7 + $0x148] sm:$0xff]  ;;  %v1840_v58 = vld [vmem:[#allocation7 + $0x38] sm:$0xff]  ;;  %p1448_p8 = pnand %p1447_p5, %p1443_p13 }
  0x61   : > { %615 = vmatpush.msra.mxu1 %v1784_v28  ;;  %674 = vmatpush.msrb.mxu0 %v1788_v29  ;;  %2151 = vst [vmem:[#allocation25_spill] sm:$0xff] %v1821_v48  ;;  %v1832_v55 = vld [vmem:[#allocation7 + $0x1c8] sm:$0xff]  ;;  %v1842_v59 = vld [vmem:[#allocation7 + $0x140] sm:$0xff]  ;;  %v390_v63 = vld [vmem:[#allocation7 + $0x30] sm:$0xff] }
  0x62   : > { %637 = vmatpush.msra.mxu2 %v1743_v13  ;;  %655 = vmatpush.msra.mxu3 %v1803_v38  ;;  %v1834_v56 = vld [vmem:[#allocation7 + $0x88] sm:$0xff]  ;;  %v1844_v60 = vld [vmem:[#allocation7 + $0x1c0] sm:$0xff]  ;;  %v1855_v0 = vld [vmem:[#allocation7 + $0x138] sm:$0xff] }
  0x63   : > { %616 = vmatpush.msra.mxu1 %v1801_v37  ;;  %675 = vmatpush.msrb.mxu0 %v1805_v39  ;;  %2152 = vst [vmem:[#allocation26_spill] sm:$0xff] %v1834_v56  ;;  %v1851_v62 = vld [vmem:[#allocation7 + $0x80] sm:$0xff]  ;;  %v1857_v1 = vld [vmem:[#allocation7 + $0x1b8] sm:$0xff] }
  0x64   : > { %638 = vmatpush.msra.mxu2 %v1753_v17  ;;  %656 = vmatpush.msra.mxu3 %v1815_v44  ;;  %2154 = vst [vmem:[#allocation28_spill] sm:$0xff] %v1851_v62 }
  0x65   : > { %617 = vmatpush.msra.mxu1 %v1813_v43  ;;  %676 = vmatpush.msrb.mxu0 %v1817_v45 }
  0x66   : > { %639 = vmatpush.msra.mxu2 %v1767_v22  ;;  %657 = vmatpush.msra.mxu3 %v1827_v52 }
  0x67   : > { %618 = vmatpush.msra.mxu1 %v1825_v51  ;;  %677 = vmatpush.msrb.mxu0 %v1832_v55 }
  0x68   : > { %640 = vmatpush.msra.mxu2 %v1781_v27  ;;  %658 = vmatpush.msra.mxu3 %v1842_v59 }
  0x69   : > { %619 = vmatpush.msra.mxu1 %v1840_v58  ;;  %678 = vmatpush.msrb.mxu0 %v1844_v60 }
  0x6a   : > { %641 = vmatpush.msra.mxu2 %v1791_v30  ;;  %659 = vmatpush.msra.mxu3 %v1855_v0 }
  0x6b   : > { %620 = vmatpush.msra.mxu1 %v390_v63  ;;  %679 = vmatpush.msrb.mxu0 %v1857_v1 }
  0x6c   : > { %642 = vmatpush.msra.mxu2 %v1798_v36 }
  0x6e   : > { %643 = vmatpush.msra.mxu2 %v1809_v41  ;;  %v1900_v41 = vld [vmem:[#allocation7 + $0x180] sm:$0xff] }
  0x70   : > { %644 = vmatpush.msra.mxu2 %v1821_v48  ;;  %v1898_v48 = vld [vmem:[#allocation7 + $0x100] sm:$0xff] }
  0x72   : > { %645 = vmatpush.msra.mxu2 %v1834_v56  ;;  %v1894_v56 = vld [vmem:[#allocation7 + $0x188] sm:$0xff] }
  0x74   : > { %646 = vmatpush.msra.mxu2 %v1851_v62  ;;  %v1892_v62 = vld [vmem:[#allocation7 + $0x108] sm:$0xff] }
  0xca   : > { %538 = vadd.xlane.f32.xlu0 %v537_v4  ;;  %v389_v4 = vld [vmem:[#allocation7 + $0x28] sm:$0xff] }
  0xcb   : > { %621 = vmatpush.msra.mxu1 %v389_v4 }
  0xd6   : > { %v599_v50 = vpop.f32.mrf.mxu0 }
  0xd7   : > { %v605_v54 = vadd.f32 %v599_v50, %v1713_v3  ;;  %v385_v50 = vld [vmem:[#allocation7 + $0x8] sm:$0xff] }
  0xfd   : > { %v1735_v10 = vpop.trf.xlu0 }
  0xfe   : > { %1156 = vmatmul.msk.f32.gmra.mxu0 %vm536_vm0, %v1735_v10  ;;  %v540_v11 = vsel %vm536_vm0, %v1735_v10, 0.0 }
  0xff   : > { %541 = vadd.xlane.f32.xlu1 %v540_v11  ;;  %v1862_v11 = vld [vmem:[#allocation7 + $0x130] sm:$0xff] }
 0x100   : > { %660 = vmatpush.msra.mxu3 %v1862_v11 }
 0x13d   : > { %v539_v31 = vpop.xlane.xlu0 %538 }
 0x13e   : > { %v543_v32 = vadd.f32 1.0, %v539_v31  ;;  %v1864_v31 = vld [vmem:[#allocation7 + $0x1b0] sm:$0xff] }
 0x13f   : > { %680 = vmatpush.msrb.mxu0 %v1864_v31 }
 0x140   : > { %1254 = vrcp.f32 %v543_v32  ;;  %v556_v42 = vand.u32 2147483648, %v543_v32  ;;  %vm550_vm1 = vweird.f32 %v543_v32  ;;  %v554_v47 = vand.u32 2147483647, %v543_v32 }
 0x142   : > { %v557_v49 = vor.u32 1.1754944e-38, %v556_v42  ;;  %vm555_vm4 = vcmp.eq.f32.partialorder %v554_v47, 8.507059e+37  ;;  %v1876_v42 = vld [vmem:[#allocation7 + $0x1a0] sm:$0xff]  ;;  %v1880_v47 = vld [vmem:[#allocation7 + $0x118] sm:$0xff] }
 0x146   : > { %v1255_v33 = vpop.eup %1254 }
 0x147   : > { %v546_v34 = vmul.f32 %v1255_v33, %v543_v32  ;;  %vm551_vm2 = vweird.f32 %v1255_v33  ;;  %v388_v32 = vld [vmem:[#allocation7 + $0x20] sm:$0xff] }
 0x148   : > { %vm552_vm3 = vmor %vm550_vm1, %vm551_vm2  ;;  %622 = vmatpush.msra.mxu1 %v388_v32 }
 0x149   : > { %v547_v35 = vsub.f32 1.0, %v546_v34  ;;  %v1870_v34 = vld [vmem:[#allocation7 + $0x1a8] sm:$0xff] }
 0x14a   : > { %681 = vmatpush.msrb.mxu0 %v1870_v34 }
 0x14b   : > { %v548_v40 = vmul.f32 %v1255_v33, %v547_v35  ;;  %v387_v35 = vld [vmem:[#allocation7 + $0x18] sm:$0xff] }
 0x14c   : > { %623 = vmatpush.msra.mxu1 %v387_v35  ;;  %682 = vmatpush.msrb.mxu0 %v1876_v42 }
 0x14d   : > { %v549_v46 = vadd.f32 %v1255_v33, %v548_v40  ;;  %v1874_v40 = vld [vmem:[#allocation7 + $0x120] sm:$0xff] }
 0x14f   : > { %v553_v53 = vsel %vm552_vm3, %v1255_v33, %v549_v46  ;;  %v1868_v33 = vld [vmem:[#allocation7 + $0x128] sm:$0xff]  ;;  %v386_v46 = vld [vmem:[#allocation7 + $0x10] sm:$0xff] }
 0x150   : > { %v1836_v57 = vsel %vm555_vm4, %v557_v49, %v553_v53  ;;  %661 = vmatpush.msra.mxu3 %v1868_v33  ;;  %v1882_v49 = vld [vmem:[#allocation7 + $0x198] sm:$0xff]  ;;  %624 = vmatpush.msra.mxu1 %v386_v46  ;;  %v1886_v53 = vld [vmem:[#allocation7 + $0x110] sm:$0xff] }
 0x151   : > { %2153 = vst [vmem:[#allocation27_spill] sm:$0xff] %v1836_v57  ;;  %v1847_v61 = vmul.f32 %v605_v54, %v1836_v57  ;;  %683 = vmatpush.msrb.mxu0 %v1882_v49  ;;  %v1888_v54 = vld [vmem:[#allocation7 + $0x190] sm:$0xff]  ;;  %v384_v57 = vld [vmem:[#allocation7] sm:$0xff] }
 0x152   : > { %662 = vmatpush.msra.mxu3 %v1874_v40  ;;  %625 = vmatpush.msra.mxu1 %v385_v50 }
 0x153   : > { %647 = vmatmul.f32.vlgmr.msra.gmra.mxu2 %v1847_v61  ;;  %684 = vmatpush.msrb.mxu0 %v1888_v54 }
 0x154   : > { %663 = vmatpush.msra.mxu3 %v1880_v47  ;;  %626 = vmatpush.msra.mxu1 %v384_v57 }
 0x155   : > { %685 = vmatpush.msrb.mxu0 %v1894_v56 }
 0x156   : > { %664 = vmatpush.msra.mxu3 %v1886_v53 }
 0x157   : > { %686 = vmatpush.msrb.mxu0 %v1900_v41 }
 0x158   : > { %665 = vmatpush.msra.mxu3 %v1892_v62 }
 0x159   : > { %808 = vmatpush.msra.mxu0 %v1745_v14 }
 0x15a   : > { %666 = vmatpush.msra.mxu3 %v1898_v48 }
 0x15b   : > { %809 = vmatpush.msra.mxu0 %v1749_v15 }
 0x15d   : > { %810 = vmatpush.msra.mxu0 %v1758_v19 }
 0x15f   : > { %811 = vmatpush.msra.mxu0 %v1770_v23 }
 0x161   : > { %812 = vmatpush.msra.mxu0 %v1784_v28 }
 0x163   : > { %813 = vmatpush.msra.mxu0 %v1801_v37 }
 0x165   : > { %814 = vmatpush.msra.mxu0 %v1813_v43 }
 0x167   : > { %815 = vmatpush.msra.mxu0 %v1825_v51 }
 0x169   : > { %816 = vmatpush.msra.mxu0 %v1840_v58 }
 0x16b   : > { %817 = vmatpush.msra.mxu0 %v390_v63 }
 0x16d   : > { %818 = vmatpush.msra.mxu0 %v389_v4 }
 0x16f   : > { %819 = vmatpush.msra.mxu0 %v388_v32  ;;  %v1930_v32 = vld [vmem:[#allocation8 + $0xe8] sm:$0xff] }
 0x171   : > { %820 = vmatpush.msra.mxu0 %v387_v35  ;;  %v463_v35 = vld [vmem:[#allocation8 + $0x78] sm:$0xff] }
 0x172   : > { %v542_v36 = vpop.xlane.xlu1 %541  ;;  %714 = vmatpush.msrb.mxu1 %v463_v35 }
 0x173   : > { %v544_v30 = vadd.f32 1.0, %v542_v36  ;;  %821 = vmatpush.msra.mxu0 %v386_v46  ;;  %v1933_v46 = vld [vmem:[#allocation8 + $0xe0] sm:$0xff] }
 0x175   : > { %1256 = vrcp.f32 %v544_v30  ;;  %v571_v19 = vand.u32 2147483648, %v544_v30  ;;  %v569_v36 = vand.u32 2147483647, %v544_v30  ;;  %vm565_vm6 = vweird.f32 %v544_v30  ;;  %822 = vmatpush.msra.mxu0 %v385_v50  ;;  %v1936_v50 = vld [vmem:[#allocation8 + $0xd8] sm:$0xff] }
 0x176   : > { %2156 = vst [vmem:[#allocation30_spill] sm:$0xff] %v1936_v50 }
 0x177   : > { %v572_v37 = vor.u32 1.1754944e-38, %v571_v19  ;;  %vm570_vm8 = vcmp.eq.f32.partialorder %v569_v36, 8.507059e+37  ;;  %823 = vmatpush.msra.mxu0 %v384_v57  ;;  %v462_v57 = vld [vmem:[#allocation8 + $0x70] sm:$0xff]  ;;  %v460_v19 = vld [vmem:[#allocation8 + $0x60] sm:$0xff]  ;;  %v459_v36 = vld [vmem:[#allocation8 + $0x58] sm:$0xff] }
 0x178   : > { %715 = vmatpush.msrb.mxu1 %v462_v57 }
 0x17b   : > { %v1257_v27 = vpop.eup %1256  ;;  %v602_v22 = vpop.f32.mrf.mxu0 }
 0x17c   : > { %v561_v14 = vmul.f32 %v1257_v27, %v544_v30  ;;  %vm566_vm5 = vweird.f32 %v1257_v27  ;;  %v607_v51 = vadd.f32 %v602_v22, %v1713_v3  ;;  %v1927_v22 = vld [vmem:[#allocation8 + $0xf0] sm:$0xff] }
 0x17d   : > { %vm567_vm7 = vmor %vm565_vm6, %vm566_vm5 }
 0x17e   : > { %v562_v15 = vsub.f32 1.0, %v561_v14  ;;  %v461_v14 = vld [vmem:[#allocation8 + $0x68] sm:$0xff] }
 0x17f   : > { %716 = vmatpush.msrb.mxu1 %v461_v14 }
 0x180   : > { %v563_v23 = vmul.f32 %v1257_v27, %v562_v15  ;;  %v1939_v15 = vld [vmem:[#allocation8 + $0xd0] sm:$0xff] }
 0x181   : > { %2157 = vst [vmem:[#allocation31_spill] sm:$0xff] %v1939_v15  ;;  %717 = vmatpush.msrb.mxu1 %v460_v19 }
 0x182   : > { %v564_v28 = vadd.f32 %v1257_v27, %v563_v23  ;;  %v1942_v23 = vld [vmem:[#allocation8 + $0xc8] sm:$0xff] }
 0x183   : > { %2158 = vst [vmem:[#allocation32_spill] sm:$0xff] %v1942_v23  ;;  %718 = vmatpush.msrb.mxu1 %v459_v36 }
 0x184   : > { %v568_v43 = vsel %vm567_vm7, %v1257_v27, %v564_v28  ;;  %v1924_v27 = vld [vmem:[#allocation8 + $0xf8] sm:$0xff]  ;;  %v1945_v28 = vld [vmem:[#allocation8 + $0xc0] sm:$0xff] }
 0x185   : > { %v1914_v58 = vsel %vm570_vm8, %v572_v37, %v568_v43  ;;  %734 = vmatpush.msrb.mxu2 %v1924_v27  ;;  %2159 = vst [vmem:[#allocation33_spill] sm:$0xff] %v1945_v28  ;;  %v1950_v37 = vld [vmem:[%s2103_s3] ss:$0 sm:$0xff]  ;;  %v458_v43 = vld [vmem:[#allocation8 + $0x50] sm:$0xff] }
 0x186   : > { %2155 = vst [vmem:[#allocation29_spill] sm:$0xff] %v1914_v58  ;;  %v1917_v63 = vmul.f32 %v607_v51, %v1914_v58  ;;  %v1953_v51 = vld [vmem:[#allocation8 + $0xb8] sm:$0xff]  ;;  %719 = vmatpush.msrb.mxu1 %v458_v43 }
 0x187   : > { %735 = vmatpush.msrb.mxu2 %v1927_v22  ;;  %2160 = vst [vmem:[#allocation34_spill] sm:$0xff] %v1950_v37  ;;  %v455_v58 = vld [vmem:[#allocation8 + $0x38] sm:$0xff] }
 0x188   : > { %627 = vmatmul.f32.vlgmr.msra.gmra.mxu1 %v1917_v63  ;;  %v609_v4 = vmul.f32 %v1917_v63, %v1847_v61  ;;  %v610_v30 = vsub.f32 %v1917_v63, %v1847_v61  ;;  %2161 = vst [vmem:[#allocation35_spill] sm:$0xff] %v1953_v51 }
 0x189   : > { %736 = vmatpush.msrb.mxu2 %v1930_v32 }
 0x18a   : > { %667 = vmatmul.f32.vlgmr.msra.gmra.mxu3 %v609_v4  ;;  %687 = vmatmul.f32.vlgmr.msrb.gmra.mxu0 %v610_v30  ;;  %v457_v4 = vld [vmem:[#allocation8 + $0x48] sm:$0xff] }
 0x18b   : > { %737 = vmatpush.msrb.mxu2 %v1933_v46  ;;  %911 = vmatpush.msrb.mxu0 %v463_v35  ;;  %v1956_v35 = vld [vmem:[#allocation8 + $0xb0] sm:$0xff] }
 0x18c   : > { %2162 = vst [vmem:[#allocation36_spill] sm:$0xff] %v1956_v35  ;;  %720 = vmatpush.msrb.mxu1 %v457_v4 }
 0x18d   : > { %738 = vmatpush.msrb.mxu2 %v1936_v50  ;;  %912 = vmatpush.msrb.mxu0 %v462_v57  ;;  %v456_v57 = vld [vmem:[#allocation8 + $0x40] sm:$0xff] }
 0x18e   : > { %721 = vmatpush.msrb.mxu1 %v456_v57 }
 0x18f   : > { %739 = vmatpush.msrb.mxu2 %v1939_v15  ;;  %913 = vmatpush.msrb.mxu0 %v461_v14  ;;  %v1958_v14 = vld [vmem:[#allocation8 + $0xa8] sm:$0xff] }
 0x190   : > { %2163 = vst [vmem:[#allocation37_spill] sm:$0xff] %v1958_v14  ;;  %722 = vmatpush.msrb.mxu1 %v455_v58  ;;  %v453_v15 = vld [vmem:[#allocation8 + $0x28] sm:$0xff] }
 0x191   : > { %740 = vmatpush.msrb.mxu2 %v1942_v23  ;;  %914 = vmatpush.msrb.mxu0 %v460_v19 }
 0x193   : > { %741 = vmatpush.msrb.mxu2 %v1945_v28  ;;  %915 = vmatpush.msrb.mxu0 %v459_v36  ;;  %v1962_v28 = vld [vmem:[#allocation8 + $0xa0] sm:$0xff]  ;;  %v454_v36 = vld [vmem:[#allocation8 + $0x30] sm:$0xff] }
 0x194   : > { %2164 = vst [vmem:[#allocation38_spill] sm:$0xff] %v1962_v28  ;;  %723 = vmatpush.msrb.mxu1 %v454_v36 }
 0x195   : > { %742 = vmatpush.msrb.mxu2 %v1953_v51  ;;  %916 = vmatpush.msrb.mxu0 %v458_v43  ;;  %v1965_v51 = vld [vmem:[#allocation8 + $0x98] sm:$0xff] }
 0x196   : > { %724 = vmatpush.msrb.mxu1 %v453_v15 }
 0x197   : > { %743 = vmatpush.msrb.mxu2 %v1956_v35  ;;  %917 = vmatpush.msrb.mxu0 %v457_v4  ;;  %v1968_v35 = vld [vmem:[#allocation8 + $0x90] sm:$0xff] }
 0x199   : > { %744 = vmatpush.msrb.mxu2 %v1958_v14  ;;  %918 = vmatpush.msrb.mxu0 %v456_v57  ;;  %v1971_v14 = vld [vmem:[#allocation8 + $0x88] sm:$0xff] }
 0x19b   : > { %745 = vmatpush.msrb.mxu2 %v1962_v28  ;;  %919 = vmatpush.msrb.mxu0 %v455_v58  ;;  %v451_v28 = vld [vmem:[#allocation8 + $0x18] sm:$0xff] }
 0x19d   : > { %746 = vmatpush.msrb.mxu2 %v1965_v51  ;;  %920 = vmatpush.msrb.mxu0 %v454_v36  ;;  %v449_v36 = vld [vmem:[#allocation8 + $0x8] sm:$0xff] }
 0x19f   : > { %747 = vmatpush.msrb.mxu2 %v1968_v35  ;;  %921 = vmatpush.msrb.mxu0 %v453_v15 }
 0x1a1   : > { %748 = vmatpush.msrb.mxu2 %v1971_v14 }
 0x1d6   : > { %v648_v23 = vpop.f32.mrf.mxu2 }
 0x205   : > { %v628_v30 = vpop.f32.mrf.mxu1 }
 0x206   : > { %v629_v19 = vadd.f32 %v1950_v37, %v628_v30  ;;  %v452_v37 = vld [vmem:[#allocation8 + $0x20] sm:$0xff] }
 0x207   : > { %v688_v50 = vpop.f32.mrf.mxu0  ;;  %725 = vmatpush.msrb.mxu1 %v452_v37  ;;  %922 = vmatpush.msrb.mxu0 %v452_v37 }
 0x208   : > { %v649_v43 = vadd.f32 %v648_v23, %v629_v19  ;;  %v1974_v23 = vld [vmem:[#allocation8 + $0x80] sm:$0xff]  ;;  %v450_v19 = vld [vmem:[#allocation8 + $0x10] sm:$0xff] }
 0x209   : > { %726 = vmatpush.msrb.mxu1 %v451_v28  ;;  %749 = vmatpush.msrb.mxu2 %v1974_v23 }
 0x20a   : > { %923 = vmatpush.msrb.mxu0 %v451_v28 }
 0x20b   : > { %868 = vmatpush.msra.mxu2 %v1756_v18  ;;  %727 = vmatpush.msrb.mxu1 %v450_v19 }
 0x20c   : > { %924 = vmatpush.msrb.mxu0 %v450_v19 }
 0x20d   : > { %v668_v30 = vpop.f32.mrf.mxu3  ;;  %869 = vmatpush.msra.mxu2 %v1764_v21  ;;  %728 = vmatpush.msrb.mxu1 %v449_v36 }
 0x20e   : > { %v669_v4 = vadd.f32 %v668_v30, %v649_v43  ;;  %925 = vmatpush.msrb.mxu0 %v449_v36  ;;  %v2176_v30 = vld [vmem:[#allocation33_spill] sm:$0xff] }
 0x20f   : > { %870 = vmatpush.msra.mxu2 %v1776_v25 }
 0x210   : > { %v689_v57 = vadd.f32 %v688_v50, %v669_v4  ;;  %v448_v50 = vld [vmem:[#allocation8] sm:$0xff]  ;;  %v2177_v4 = vld [vmem:[#allocation35_spill] sm:$0xff] }
 0x211   : > { %729 = vmatpush.msrb.mxu1 %v448_v50  ;;  %871 = vmatpush.msra.mxu2 %v1788_v29 }
 0x212   : > { %v1157_v58 = vmul.f32 -1.442695, %v689_v57  ;;  %730 = vmatmul.f32.vlgmr.msrb.gmra.mxu1 %v1713_v3  ;;  %926 = vmatpush.msrb.mxu0 %v448_v50  ;;  %v2178_v57 = vld [vmem:[#allocation36_spill] sm:$0xff] }
 0x213   : > { %848 = vmatpush.msra.mxu1 %v1751_v16  ;;  %872 = vmatpush.msra.mxu2 %v1805_v39 }
 0x214   : > { %1258 = vpow2.f32 %v1157_v58  ;;  %v2179_v58 = vld [vmem:[#allocation37_spill] sm:$0xff] }
 0x215   : > { %849 = vmatpush.msra.mxu1 %v1762_v20  ;;  %873 = vmatpush.msra.mxu2 %v1817_v45 }
 0x217   : > { %850 = vmatpush.msra.mxu1 %v1772_v24  ;;  %874 = vmatpush.msra.mxu2 %v1832_v55 }
 0x219   : > { %851 = vmatpush.msra.mxu1 %v1778_v26  ;;  %875 = vmatpush.msra.mxu2 %v1844_v60 }
 0x21a   : > { %v1259_v15 = vpop.eup %1258 }
 0x21b   : > { %v694_v37 = vadd.f32 1.0, %v1259_v15  ;;  %852 = vmatpush.msra.mxu1 %v1803_v38  ;;  %876 = vmatpush.msra.mxu2 %v1857_v1  ;;  %v2182_v15 = vld [vmem:[#allocation29_spill] sm:$0xff] }
 0x21d   : > { %1260 = vrcp.f32 %v694_v37  ;;  %853 = vmatpush.msra.mxu1 %v1815_v44  ;;  %877 = vmatpush.msra.mxu2 %v1864_v31  ;;  %v706_v20 = vand.u32 2147483648, %v694_v37  ;;  %v704_v25 = vand.u32 2147483647, %v694_v37  ;;  %vm700_vm10 = vweird.f32 %v694_v37 }
 0x21f   : > { %854 = vmatpush.msra.mxu1 %v1827_v52  ;;  %878 = vmatpush.msra.mxu2 %v1870_v34  ;;  %v707_v29 = vor.u32 1.1754944e-38, %v706_v20  ;;  %vm705_vm12 = vcmp.eq.f32.partialorder %v704_v25, 8.507059e+37 }
 0x221   : > { %855 = vmatpush.msra.mxu1 %v1842_v59  ;;  %879 = vmatpush.msra.mxu2 %v1876_v42 }
 0x223   : > { %v1261_v18 = vpop.eup %1260  ;;  %856 = vmatpush.msra.mxu1 %v1855_v0  ;;  %880 = vmatpush.msra.mxu2 %v1882_v49 }
 0x224   : > { %v696_v16 = vmul.f32 %v1261_v18, %v694_v37  ;;  %vm701_vm9 = vweird.f32 %v1261_v18 }
 0x225   : > { %vm702_vm11 = vmor %vm700_vm10, %vm701_vm9  ;;  %857 = vmatpush.msra.mxu1 %v1862_v11  ;;  %881 = vmatpush.msra.mxu2 %v1888_v54 }
 0x226   : > { %v697_v21 = vsub.f32 1.0, %v696_v16 }
 0x227   : > { %858 = vmatpush.msra.mxu1 %v1868_v33  ;;  %882 = vmatpush.msra.mxu2 %v1894_v56 }
 0x228   : > { %v698_v24 = vmul.f32 %v1261_v18, %v697_v21 }
 0x229   : > { %859 = vmatpush.msra.mxu1 %v1874_v40  ;;  %883 = vmatpush.msra.mxu2 %v1900_v41 }
 0x22a   : > { %v699_v26 = vadd.f32 %v1261_v18, %v698_v24 }
 0x22b   : > { %860 = vmatpush.msra.mxu1 %v1880_v47 }
 0x22c   : > { %v703_v38 = vsel %vm702_vm11, %v1261_v18, %v699_v26 }
 0x22d   : > { %v708_v39 = vsel %vm705_vm12, %v707_v29, %v703_v38  ;;  %861 = vmatpush.msra.mxu1 %v1886_v53 }
 0x22e   : > { %v710_v44 = vsub.f32 1.0, %v708_v39  ;;  %v712_v52 = vmul.f32 %v708_v39, %v1847_v61 }
 0x22f   : > { %862 = vmatpush.msra.mxu1 %v1892_v62 }
 0x230   : > { %v711_v45 = vmul.f32 %v710_v44, %v1917_v63 }
 0x231   : > { %863 = vmatpush.msra.mxu1 %v1898_v48 }
 0x232   : > { %v713_v55 = vadd.f32 %v712_v52, %v711_v45 }
 0x234   : > { %750 = vmatmul.f32.vlgmr.msrb.gmra.mxu2 %v713_v55 }
 0x28f   : > { %v731_v59 = vpop.f32.mrf.mxu1 }
 0x2b7   : > { %v751_v60 = vpop.f32.mrf.mxu2 }
 0x2b8   : > { %v752_v0 = vadd.f32 %v751_v60, %v731_v59 }
 0x2ba   : > { %v1158_v61 = vmul.f32 -1.442695, %v752_v0 }
 0x2bc   : > { %1262 = vpow2.f32 %v1158_v61 }
 0x2c2   : > { %v1263_v56 = vpop.eup %1262 }
 0x2c3   : > { %v757_v1 = vadd.f32 1.0, %v1263_v56 }
 0x2c5   : > { %1264 = vrcp.f32 %v757_v1  ;;  %v769_v33 = vand.u32 2147483648, %v757_v1  ;;  %v767_v40 = vand.u32 2147483647, %v757_v1  ;;  %vm763_vm14 = vweird.f32 %v757_v1 }
 0x2c7   : > { %v770_v62 = vor.u32 1.1754944e-38, %v769_v33  ;;  %vm768_vm1 = vcmp.eq.f32.partialorder %v767_v40, 8.507059e+37  ;;  %v494_v40 = vld [vmem:[#allocation10 + $0x70] sm:$0xff] }
 0x2cb   : > { %v1265_v11 = vpop.eup %1264 }
 0x2cc   : > { %v759_v31 = vmul.f32 %v1265_v11, %v757_v1  ;;  %vm764_vm13 = vweird.f32 %v1265_v11 }
 0x2cd   : > { %vm765_vm15 = vmor %vm763_vm14, %vm764_vm13 }
 0x2ce   : > { %v760_v41 = vsub.f32 1.0, %v759_v31 }
 0x2d0   : > { %v761_v34 = vmul.f32 %v1265_v11, %v760_v41 }
 0x2d2   : > { %v762_v42 = vadd.f32 %v1265_v11, %v761_v34  ;;  %v495_v34 = vld [vmem:[#allocation10 + $0x78] sm:$0xff] }
 0x2d3   : > { %979 = vmatpush.msrb.mxu1 %v495_v34 }
 0x2d4   : > { %v766_v48 = vsel %vm765_vm15, %v1265_v11, %v762_v42  ;;  %v493_v42 = vld [vmem:[#allocation10 + $0x68] sm:$0xff] }
 0x2d5   : > { %v771_v47 = vsel %vm768_vm1, %v770_v62, %v766_v48  ;;  %980 = vmatpush.msrb.mxu1 %v494_v40  ;;  %v492_v62 = vld [vmem:[#allocation10 + $0x60] sm:$0xff]  ;;  %v491_v48 = vld [vmem:[#allocation10 + $0x58] sm:$0xff] }
 0x2d6   : > { %v773_v49 = vsub.f32 1.0, %v771_v47  ;;  %v775_v54 = vmul.f32 %v771_v47, %v713_v55  ;;  %v490_v47 = vld [vmem:[#allocation10 + $0x50] sm:$0xff] }
 0x2d7   : > { %981 = vmatpush.msrb.mxu1 %v493_v42 }
 0x2d8   : > { %v774_v53 = vmul.f32 %v773_v49, %v1713_v3  ;;  %v489_v49 = vld [vmem:[#allocation10 + $0x48] sm:$0xff] }
 0x2d9   : > { %982 = vmatpush.msrb.mxu1 %v492_v62 }
 0x2da   : > { %v776_v63 = vadd.f32 %v775_v54, %v774_v53  ;;  %v488_v53 = vld [vmem:[#allocation10 + $0x40] sm:$0xff]  ;;  %v487_v54 = vld [vmem:[#allocation10 + $0x38] sm:$0xff] }
 0x2db   : > { %983 = vmatpush.msrb.mxu1 %v491_v48 }
 0x2dc   : > { %v777_v28 = vadd.f32 %v776_v63, %v1713_v3  ;;  %v2166_v3 = vld [vmem:[#allocation21_spill] sm:$0xff]  ;;  %v486_v63 = vld [vmem:[#allocation10 + $0x30] sm:$0xff] }
 0x2dd   : > { %984 = vmatpush.msrb.mxu1 %v490_v47 }
 0x2de   : > { %v2015_v43 = vmul.f32 0.70710677, %v777_v28  ;;  %v485_v28 = vld [vmem:[#allocation10 + $0x28] sm:$0xff] }
 0x2df   : > { %985 = vmatpush.msrb.mxu1 %v489_v49 }
 0x2e0   : > { %794 = vmatpush.msrb.mxu3 %v2015_v43 }
 0x2e1   : > { %1159 = vmatmul.msk.f32.vlgmr.msrb.gmra.mxu3 %vm536_vm0, %v1710_v2  ;;  %v2165_v2 = vld [vmem:[#allocation20_spill] sm:$0xff]  ;;  %986 = vmatpush.msrb.mxu1 %v488_v53 }
 0x2e2   : > { %828 = vmatpush.msra.mxu3 %v1720_v5  ;;  %v2167_v5 = vld [vmem:[#allocation22_spill] sm:$0xff] }
 0x2e3   : > { %987 = vmatpush.msrb.mxu1 %v487_v54 }
 0x2e4   : > { %829 = vmatpush.msra.mxu3 %v1722_v6  ;;  %v2168_v6 = vld [vmem:[#allocation23_spill] sm:$0xff] }
 0x2e5   : > { %988 = vmatpush.msrb.mxu1 %v486_v63 }
 0x2e6   : > { %830 = vmatpush.msra.mxu3 %v1725_v7  ;;  %v2169_v7 = vld [vmem:[#allocation24_spill] sm:$0xff] }
 0x2e7   : > { %989 = vmatpush.msrb.mxu1 %v485_v28 }
 0x2e8   : > { %831 = vmatpush.msra.mxu3 %v1728_v8  ;;  %v2170_v8 = vld [vmem:[#allocation25_spill] sm:$0xff] }
 0x2e9   : > { %1160 = vmatmul.msk.f32.gmra.mxu3 %vm536_vm0, %v1735_v10  ;;  %v2171_v10 = vld [vmem:[#allocation26_spill] sm:$0xff] }
 0x2ea   : > { %832 = vmatpush.msra.mxu3 %v1731_v9  ;;  %v2172_v9 = vld [vmem:[#allocation28_spill] sm:$0xff] }
 0x2ec   : > { %833 = vmatpush.msra.mxu3 %v1741_v12  ;;  %v2173_v12 = vld [vmem:[#allocation30_spill] sm:$0xff] }
 0x2ee   : > { %834 = vmatpush.msra.mxu3 %v1743_v13  ;;  %v2174_v13 = vld [vmem:[#allocation31_spill] sm:$0xff] }
 0x2f0   : > { %835 = vmatpush.msra.mxu3 %v1753_v17  ;;  %v2175_v17 = vld [vmem:[#allocation32_spill] sm:$0xff] }
 0x2f2   : > { %836 = vmatpush.msra.mxu3 %v2165_v2  ;;  %v484_v2 = vld [vmem:[#allocation10 + $0x20] sm:$0xff] }
 0x2f3   : > { %990 = vmatpush.msrb.mxu1 %v484_v2 }
 0x2f4   : > { %837 = vmatpush.msra.mxu3 %v2166_v3  ;;  %v483_v3 = vld [vmem:[#allocation10 + $0x18] sm:$0xff] }
 0x2f5   : > { %991 = vmatpush.msrb.mxu1 %v483_v3 }
 0x2f6   : > { %838 = vmatpush.msra.mxu3 %v2167_v5 }
 0x2f8   : > { %839 = vmatpush.msra.mxu3 %v2168_v6 }
 0x2fa   : > { %840 = vmatpush.msra.mxu3 %v2169_v7 }
 0x2fc   : > { %841 = vmatpush.msra.mxu3 %v2170_v8  ;;  %v482_v8 = vld [vmem:[#allocation10 + $0x10] sm:$0xff] }
 0x2fd   : > { %992 = vmatpush.msrb.mxu1 %v482_v8 }
 0x2fe   : > { %842 = vmatpush.msra.mxu3 %v2171_v10 }
 0x300   : > { %843 = vmatpush.msra.mxu3 %v2172_v9  ;;  %v481_v9 = vld [vmem:[#allocation10 + $0x8] sm:$0xff] }
 0x301   : > { %993 = vmatpush.msrb.mxu1 %v481_v9 }
 0x302   : > { %931 = vmatpush.msrb.mxu3 %v1924_v27  ;;  %v2180_v27 = vld [vmem:[#allocation38_spill] sm:$0xff] }
 0x304   : > { %932 = vmatpush.msrb.mxu3 %v1927_v22 }
 0x306   : > { %933 = vmatpush.msrb.mxu3 %v1930_v32 }
 0x308   : > { %934 = vmatpush.msrb.mxu3 %v1933_v46  ;;  %v2181_v46 = vld [vmem:[#allocation27_spill] sm:$0xff] }
 0x30a   : > { %935 = vmatpush.msrb.mxu3 %v2173_v12  ;;  %v480_v12 = vld [vmem:[#allocation10] sm:$0xff] }
 0x30b   : > { %994 = vmatpush.msrb.mxu1 %v480_v12 }
 0x30c   : > { %936 = vmatpush.msrb.mxu3 %v2174_v13 }
 0x30e   : > { %937 = vmatpush.msrb.mxu3 %v2175_v17 }
 0x310   : > { %938 = vmatpush.msrb.mxu3 %v2176_v30 }
 0x312   : > { %939 = vmatpush.msrb.mxu3 %v2177_v4 }
 0x314   : > { %940 = vmatpush.msrb.mxu3 %v2178_v57 }
 0x316   : > { %941 = vmatpush.msrb.mxu3 %v2179_v58 }
 0x318   : > { %942 = vmatpush.msrb.mxu3 %v2180_v27 }
 0x31a   : > { %943 = vmatpush.msrb.mxu3 %v1965_v51 }
 0x31c   : > { %944 = vmatpush.msrb.mxu3 %v1968_v35 }
 0x31e   : > { %945 = vmatpush.msrb.mxu3 %v1971_v14  ;;  %v2183_v14 = vld [vmem:[#allocation34_spill] sm:$0xff] }
 0x320   : > { %946 = vmatpush.msrb.mxu3 %v1974_v23 }
 0x364   : > { %v796_v22 = vpop.f32.mrf.mxu3 }
 0x365   : > { %v802_v32 = vadd.f32 %v796_v22, %v2015_v43 }
 0x367   : > { %v803_v19 = vmul.f32 %v802_v32, %v2181_v46 }
 0x369   : > { %844 = vmatmul.f32.vlgmr.msra.gmra.mxu3 %v803_v19 }
 0x36c   : > { %v799_v36 = vpop.f32.mrf.mxu3 }
 0x36d   : > { %v804_v50 = vadd.f32 %v799_v36, %v2015_v43 }
 0x36f   : > { %v805_v37 = vmul.f32 %v804_v50, %v2182_v15 }
 0x371   : > { %824 = vmatmul.f32.vlgmr.msra.gmra.mxu0 %v805_v37  ;;  %v806_v18 = vmul.f32 %v805_v37, %v803_v19  ;;  %v807_v51 = vsub.f32 %v805_v37, %v803_v19 }
 0x373   : > { %864 = vmatmul.f32.vlgmr.msra.gmra.mxu1 %v806_v18  ;;  %884 = vmatmul.f32.vlgmr.msra.gmra.mxu2 %v807_v51 }
 0x379   : > { %927 = vmatmul.f32.vlgmr.msrb.gmra.mxu0 %v2015_v43 }
 0x3ec   : > { %v845_v16 = vpop.f32.mrf.mxu3 }
 0x3ee   : > { %v825_v35 = vpop.f32.mrf.mxu0 }
 0x3ef   : > { %v826_v23 = vadd.f32 %v2183_v14, %v825_v35  ;;  %v1253_v14 = vld [vmem:[%s2106_s6] ss:$0 sm:$0xff] }
 0x3f0   : > { %v865_v20 = vpop.f32.mrf.mxu1 }
 0x3f1   : > { %v846_v21 = vadd.f32 %v845_v16, %v826_v23 }
 0x3f3   : > { %v866_v24 = vadd.f32 %v865_v20, %v846_v21 }
 0x3f6   : > { %v885_v25 = vpop.f32.mrf.mxu2  ;;  %v928_v5 = vpop.f32.mrf.mxu0 }
 0x3f7   : > { %v886_v26 = vadd.f32 %v885_v25, %v866_v24 }
 0x3f9   : > { %v1161_v29 = vmul.f32 -1.442695, %v886_v26 }
 0x3fb   : > { %1266 = vpow2.f32 %v1161_v29 }
 0x401   : > { %v1267_v38 = vpop.eup %1266 }
 0x402   : > { %v891_v39 = vadd.f32 1.0, %v1267_v38 }
 0x404   : > { %1268 = vrcp.f32 %v891_v39  ;;  %v903_v55 = vand.u32 2147483648, %v891_v39  ;;  %v901_v60 = vand.u32 2147483647, %v891_v39  ;;  %vm897_vm2 = vweird.f32 %v891_v39 }
 0x406   : > { %v904_v61 = vor.u32 1.1754944e-38, %v903_v55  ;;  %vm902_vm4 = vcmp.eq.f32.partialorder %v901_v60, 8.507059e+37 }
 0x40a   : > { %v1269_v44 = vpop.eup %1268 }
 0x40b   : > { %v893_v45 = vmul.f32 %v1269_v44, %v891_v39  ;;  %vm898_vm0 = vweird.f32 %v1269_v44 }
 0x40c   : > { %vm899_vm3 = vmor %vm897_vm2, %vm898_vm0 }
 0x40d   : > { %v894_v52 = vsub.f32 1.0, %v893_v45 }
 0x40f   : > { %v895_v59 = vmul.f32 %v1269_v44, %v894_v52 }
 0x411   : > { %v896_v0 = vadd.f32 %v1269_v44, %v895_v59 }
 0x413   : > { %v900_v56 = vsel %vm899_vm3, %v1269_v44, %v896_v0 }
 0x414   : > { %v905_v1 = vsel %vm902_vm4, %v904_v61, %v900_v56 }
 0x415   : > { %v907_v11 = vsub.f32 1.0, %v905_v1  ;;  %v909_v41 = vmul.f32 %v905_v1, %v803_v19 }
 0x417   : > { %v908_v31 = vmul.f32 %v907_v11, %v805_v37 }
 0x419   : > { %v910_v33 = vadd.f32 %v909_v41, %v908_v31 }
 0x41b   : > { %947 = vmatmul.f32.vlgmr.msrb.gmra.mxu3 %v910_v33 }
 0x49e   : > { %v948_v6 = vpop.f32.mrf.mxu3 }
 0x49f   : > { %v949_v7 = vadd.f32 %v948_v6, %v928_v5 }
 0x4a1   : > { %v1162_v10 = vmul.f32 -1.442695, %v949_v7 }
 0x4a3   : > { %1270 = vpow2.f32 %v1162_v10 }
 0x4a9   : > { %v1271_v13 = vpop.eup %1270 }
 0x4aa   : > { %v954_v17 = vadd.f32 1.0, %v1271_v13 }
 0x4ac   : > { %1272 = vrcp.f32 %v954_v17  ;;  %v966_v58 = vand.u32 2147483648, %v954_v17  ;;  %v964_v22 = vand.u32 2147483647, %v954_v17  ;;  %vm960_vm6 = vweird.f32 %v954_v17 }
 0x4ae   : > { %v967_v46 = vor.u32 1.1754944e-38, %v966_v58  ;;  %vm965_vm8 = vcmp.eq.f32.partialorder %v964_v22, 8.507059e+37 }
 0x4b2   : > { %v1273_v30 = vpop.eup %1272 }
 0x4b3   : > { %v956_v4 = vmul.f32 %v1273_v30, %v954_v17  ;;  %vm961_vm5 = vweird.f32 %v1273_v30 }
 0x4b4   : > { %vm962_vm7 = vmor %vm960_vm6, %vm961_vm5 }
 0x4b5   : > { %v957_v57 = vsub.f32 1.0, %v956_v4 }
 0x4b7   : > { %v958_v27 = vmul.f32 %v1273_v30, %v957_v57 }
 0x4b9   : > { %v959_v32 = vadd.f32 %v1273_v30, %v958_v27 }
 0x4bb   : > { %v963_v19 = vsel %vm962_vm7, %v1273_v30, %v959_v32 }
 0x4bc   : > { %v968_v36 = vsel %vm965_vm8, %v967_v46, %v963_v19 }
 0x4bd   : > { %v970_v50 = vsub.f32 1.0, %v968_v36  ;;  %v972_v37 = vmul.f32 %v968_v36, %v910_v33 }
 0x4bf   : > { %v971_v15 = vmul.f32 %v970_v50, %v2015_v43 }
 0x4c1   : > { %v973_v18 = vadd.f32 %v972_v37, %v971_v15 }
 0x4c3   : > { %v974_v51 = vadd.f32 %v973_v18, %v2015_v43 }
 0x4c5   : > { %v975_v35 = vmul.f32 0.70710677, %v974_v51 }
 0x4c7   : > { %995 = vmatmul.f32.vlgmr.msrb.gmra.mxu1 %v975_v35 }
 0x544   : > { %v996_v23 = vpop.f32.mrf.mxu1 }
 0x545   : > { %v997_v16 = vadd.f32 %v1253_v14, %v996_v23 }
 0x547   : > { %v999_v21 = vmax.f32 %v997_v16, 0.0 }
 0x549   : > { %1000 = vst [vmem:[%s383_s23] sm:$0xff] %v999_v21 }
 0x54a   : > { %1451 = shalt.err (!%p1448_p8)
}
 0x54b   : > { %1183 = dma.vmem_to_hbm [thread:$0]  (%p1629_p0), %s1015_s2, 128, %s1017_s12, %s1002_s8  }
 0x54c PF: > { %s1028_s26 = sand.u32 1, %s1490_s24   ;;  %p2184_p10 = scmp.ge.s32.totalorder %s1502_s27, 2 }
 0x54d   : > { %s1029_s22 = scalar_lea.sflag [#allocation4], %s1028_s26 }
 0x54e   : > { %p1203_p11 = pnand %p2184_p10, %p1637_p6 }
 0x550   : > { %p1204_p12 = pneg %p1203_p11 }
 0x552   : > { %1485 = dma.done.wait (%p1204_p12), %s1029_s22, 128  }
 0x553   : > { %1487 = vsyncadd (%p1204_p12), %s1029_s22, 4294967168  ;;  %s2185_s27 = sld [smem:[#allocation18_spill]]  ;;  %s2188_s24 = smov %s1494_s25 }
 0x554   : > { %s2186_s14 = sld [smem:[#allocation17_spill]] }
 0x555   : > { %s2187_s26 = sld [smem:[#allocation19_spill]] }
 0x559   : > { %p24_p2 = scmp.ge.s32.totalorder %s2185_s27, 4  }
 0x55a   : > { %s2189_s25 = smov %s2186_s14 }
 0x55b   :  { %26 = sbr.rel (!%p24_p2) target bundleno = 12 (0xc), region = 118 }
 0x560   :  { %1035 = vsyncpa [#allocation3], 1 }
 0x561   :  { %1037 = vsyncpa [#allocation3 + $0x1], 1 }
 0x562   :  { %1038 = vsyncpa [#allocation6], 1 }
 0x563   :  { %1040 = vsyncpa [#allocation6 + $0x1], 1 }
 0x564   :  { %1041 = vsyncpa [#allocation9], 1 }
 0x565   :  { %1042 = vsyncpa [#allocation4], 1 }
 0x566   :  { %1044 = vsyncpa [#allocation4 + $0x1], 1 }

</bundles_post_ra>
